<compile_context>
chip_gen: v6e
topology: v6e:2x2x1
jax: 0.10.0
libtpu: 0.0.40
codegen_flags: <defaults>
</compile_context>

<pallas_src>
import functools

import jax
import jax.numpy as jnp
from jax import lax
from jax.experimental import pallas as pl
from jax.experimental.pallas import tpu as pltpu


def _round_up(x, m):
    return ((x + m - 1) // m) * m


def _conv1d_subsample_kernel(xm_ref, w_ref, b_ref, o_ref):
    # Fast path (K <= stride, D == 1): one matmul per tile; no halo / scratch / staging copy.
    # xm_ref: (1, TT, W2), w_ref: (1, W2, odim_p), b_ref: (1, odim_p) f32, o_ref: (1, TT, odim_p)
    acc = jnp.dot(xm_ref[0], w_ref[0], preferred_element_type=jnp.float32)
    o_ref[0] = jnp.maximum(acc + b_ref[...], 0.0).astype(o_ref.dtype)


def _conv1d_subsample_halo_kernel(xm_ref, xh_ref, w_ref, b_ref, o_ref, xc_ref, *, num_shifts):
    # xm_ref: (1, TT, W2)        main stride-phase rows            (compute dtype)
    # xh_ref: (1, H8, W2)        halo rows (first rows of next tile)
    # w_ref:  (D, W2, odim_p)    per-shift flattened weights
    # b_ref:  (1, odim_p)        bias (f32)
    # o_ref:  (1, TT, odim_p)    output tile (compute/out dtype)
    # xc_ref: (TT + H8, W2)      scratch: main ++ halo (shifted row windows must be contiguous)
    tt = o_ref.shape[1]
    # Shift 0 reads the main block directly -> first MXU pass does not depend on the copy.
    acc = jnp.dot(xm_ref[0], w_ref[0], preferred_element_type=jnp.float32)
    xc_ref[0:tt, :] = xm_ref[0]
    xc_ref[tt:, :] = xh_ref[0]
    for d in range(1, num_shifts):                          # K small -> unrolled Python loop
        acc += jnp.dot(xc_ref[pl.ds(d, tt), :], w_ref[d],
                       preferred_element_type=jnp.float32)
    o_ref[0] = jnp.maximum(acc + b_ref[...], 0.0).astype(o_ref.dtype)


def conv1d_subsampling_forward(x, x_len, weight, bias, *, kernel_size, stride, pad,
                               time_tile=512, compute_dtype=jnp.bfloat16, out_dtype=None):
    """x: (B, T, idim); weight: (odim, idim, K) (PyTorch Conv1d layout); bias: (odim,).

    Returns (out (B, T_out, odim) in `out_dtype` (defaults to `compute_dtype`), new x_len).
    Set compute_dtype=jnp.float32 for bit-closer parity with the f32 PyTorch module.
    """
    B, T, idim = x.shape
    odim, idim_w, K = weight.shape
    assert K == kernel_size and idim_w == idim
    pad_l, pad_r = pad
    out_dtype = compute_dtype if out_dtype is None else out_dtype

    Tp = T + pad_l + pad_r
    assert Tp >= K, "padded input shorter than the conv kernel"
    T_out = (Tp - K) // stride + 1

    # ---- stride-phase decomposition (no im2col) -------------------------------------------
    # x2[b, t2, s*idim + c] == x_pad[b, t2*stride + s, c]     (free, layout-preserving reshape)
    # out[t] = relu(bias + sum_{d<D} x2[t + d, :] @ V[d]),  V[d][s*idim+c, o] = W[o, c, d*stride+s]
    D = -(-K // stride)                          # number of shifted matmuls
    W2 = stride * idim
    halo = D - 1                                 # extra stride-phase rows needed past each tile
    H8 = _round_up(halo, 8) if halo else 0       # halo block rows (>= 8 => legal block)

    # ---- output-time tiling ----------------------------------------------------------------
    TT = max(8, min(time_tile, _round_up(T_out, 8)))
    # v7x megacore hygiene: keep >= ~4 grid blocks so both TensorCores get work even at B == 1.
    nt_target = -(-4 // B)
    if -(-T_out // TT) < nt_target:
        TT = max(8, _round_up(-(-T_out // nt_target), 8))
    if H8:
        TT = _round_up(TT, H8)                   # halo index_map needs H8 | TT
    NT = -(-T_out // TT)

    # ---- padded stride-phase input (ONE fused pad [+cast] pass; reshape is free) ------------
    T2_need = max(NT * TT + H8, -(-Tp // stride))    # cover tiles+halo AND the full padded signal
    T_need = T2_need * stride
    assert T_need >= Tp                              # every row a valid output reads is present
    right = T_need - T - pad_l
    assert right >= pad_r >= 0
    x_c = x if x.dtype == compute_dtype else x.astype(compute_dtype)
    x2 = jnp.pad(x_c, ((0, 0), (pad_l, right), (0, 0))).reshape(B, T2_need, W2)

    # ---- weights: (odim, idim, K) -> (D, stride*idim, odim_p); zero-pad extra taps/channels --
    odim_p = _round_up(odim, 128)                # lane-dense output / full MXU columns
    wt = jnp.transpose(weight, (2, 1, 0))                                  # (K, idim, odim)
    wt = jnp.pad(wt, ((0, D * stride - K), (0, 0), (0, odim_p - odim)))    # (D*stride, idim, odim_p)
    w_d = wt.reshape(D, W2, odim_p).astype(compute_dtype)
    b2 = jnp.pad(bias, (0, odim_p - odim)).reshape(1, odim_p).astype(jnp.float32)

    To8 = _round_up(T_out, 8)                    # minimal padded output rows (masked OOB stores)

    # ---- specs -------------------------------------------------------------------------------
    in_specs = [pl.BlockSpec((1, TT, W2), lambda b, j: (b, j, 0))]                    # main tile
    operands = [x2]
    if D > 1:
        in_specs.append(pl.BlockSpec((1, H8, W2),
                                     lambda b, j: (b, (j + 1) * (TT // H8), 0)))      # halo rows
        operands.append(x2)
    in_specs += [
        pl.BlockSpec((D, W2, odim_p), lambda b, j: (0, 0, 0)),                        # weights
        pl.BlockSpec((1, odim_p), lambda b, j: (0, 0)),                               # bias
    ]
    operands += [w_d, b2]

    scratch_shapes = [pltpu.VMEM((TT + H8, W2), compute_dtype)] if D > 1 else []
    kernel = (functools.partial(_conv1d_subsample_halo_kernel, num_shifts=D)
              if D > 1 else _conv1d_subsample_kernel)

    # ---- VMEM limit derived from the actual block footprint (+50% headroom, v7x-safe) --------
    csz = jnp.dtype(compute_dtype).itemsize
    osz = jnp.dtype(out_dtype).itemsize
    blk = (TT * W2 * csz + (H8 * W2 * csz if D > 1 else 0)        # inputs
           + D * W2 * odim_p * csz + odim_p * 4                    # weights + bias
           + TT * odim_p * osz)                                    # output
    scratch_bytes = (TT + H8) * W2 * csz if D > 1 else 0
    vmem_est = 2 * blk + scratch_bytes                             # double-buffered blocks
    vmem_limit = int(min(64 << 20, max(16 << 20, vmem_est + vmem_est // 2 + (4 << 20))))

    flops = 2 * B * T_out * K * idim * odim
    bytes_accessed = int(x2.size * csz + w_d.size * csz + b2.size * 4
                         + B * To8 * odim_p * osz)

    out = pl.pallas_call(
        kernel,
        out_shape=jax.ShapeDtypeStruct((B, To8, odim_p), out_dtype),
        grid=(B, NT),
        in_specs=in_specs,
        out_specs=pl.BlockSpec((1, TT, odim_p), lambda b, j: (b, j, 0)),
        scratch_shapes=scratch_shapes,
        compiler_params=pltpu.CompilerParams(
            dimension_semantics=("parallel", "parallel"),
            vmem_limit_bytes=vmem_limit),
        cost_estimate=pl.CostEstimate(flops=flops, transcendentals=0,
                                      bytes_accessed=bytes_accessed),
    )(*operands)

    if To8 != T_out or odim_p != odim:
        out = out[:, :T_out, :odim]              # tiny (<=7 rows) / channel-pad trim only

    new_len = None if x_len is None else (x_len - 1) // stride + 1
    return out, new_len


def _reference_forward(x, x_len, weight, bias, *, stride, pad):
    """Pure-JAX mirror of the PyTorch module (NCW conv) for verification."""
    pad_l, pad_r = pad
    x_ncw = jnp.transpose(x, (0, 2, 1))                           # (B, idim, T)
    x_ncw = jnp.pad(x_ncw, ((0, 0), (0, 0), (pad_l, pad_r)))
    y = lax.conv_general_dilated(
        x_ncw, weight, window_strides=(stride,), padding="VALID",
        dimension_numbers=("NCH", "OIH", "NCH"),
        precision=lax.Precision.HIGHEST)
    y = jnp.maximum(y + bias[None, :, None], 0.0)
    y = jnp.transpose(y, (0, 2, 1))                               # (B, T_out, odim)
    new_len = None if x_len is None else (x_len - 1) // stride + 1
    return y, new_len


if __name__ == "__main__":
    master_key = jax.random.PRNGKey(0)

    def run_case(case_key, *, B, T, idim, odim, K, stride, pad, compute_dtype, tol_tight):
        kx, kw, kb = jax.random.split(case_key, 3)
        x = jax.random.normal(kx, (B, T, idim), dtype=jnp.float32)
        weight = jax.random.normal(kw, (odim, idim, K), dtype=jnp.float32) * 0.1
        bias = jax.random.normal(kb, (odim,), dtype=jnp.float32) * 0.1
        x_len = jnp.minimum(jnp.arange(B, dtype=jnp.int32) * 3 + (T - 3), T)

        out, out_len = conv1d_subsampling_forward(
            x, x_len, weight, bias, kernel_size=K, stride=stride, pad=pad,
            compute_dtype=compute_dtype)
        out = jax.block_until_ready(out)
        out_len = jax.block_until_ready(out_len)
        out_f32 = out.astype(jnp.float32)

        # tight check: reference on inputs rounded to the compute dtype (same rounding as kernel)
        x_r = x.astype(compute_dtype).astype(jnp.float32)
        w_r = weight.astype(compute_dtype).astype(jnp.float32)
        ref, ref_len = _reference_forward(x_r, x_len, w_r, bias, stride=stride, pad=pad)
        assert out.shape == ref.shape, (out.shape, ref.shape)
        err = float(jnp.max(jnp.abs(out_f32 - ref)))
        assert jnp.allclose(out_f32, ref, atol=tol_tight, rtol=tol_tight), \
            f"mismatch vs rounded-input reference (max abs err {err})"
        # loose sanity check against the full-f32 module semantics
        ref_f32, _ = _reference_forward(x, x_len, weight, bias, stride=stride, pad=pad)
        assert jnp.allclose(out_f32, ref_f32, atol=5e-2, rtol=5e-2), "mismatch vs f32 reference"
        assert jnp.array_equal(out_len, ref_len), "length mismatch"

    k1, k2, k3 = jax.random.split(master_key, 3)
    # D = 2 (K > stride), bf16 compute + bf16 output, T_out % 8 == 0 (no post-slice on time)
    run_case(k1, B=2, T=16, idim=8, odim=16, K=3, stride=2, pad=(1, 1),
             compute_dtype=jnp.bfloat16, tol_tight=2e-2)
    # D = 1 fast path (K == stride, no halo/scratch), partial last output block (T_out = 6)
    run_case(k2, B=2, T=13, idim=8, odim=16, K=2, stride=2, pad=(0, 0),
             compute_dtype=jnp.bfloat16, tol_tight=2e-2)
    # f32 parity mode: D = 2, pad_l % stride != 0 (phase shift), B = 1 (megacore tile logic)
    run_case(k3, B=1, T=20, idim=6, odim=10, K=5, stride=3, pad=(2, 2),
             compute_dtype=jnp.float32, tol_tight=1e-4)

    print("KERNEL_OK")
</pallas_src>

<mosaic_0001>
module attributes {stable_mosaic.version = 11 : i64} {
  func.func @_conv1d_subsample_halo_kernel(%arg0: i32, %arg1: i32, %arg2: memref<1x8x16xbf16, #tpu.memory_space<vmem>>, %arg3: memref<1x8x16xbf16, #tpu.memory_space<vmem>>, %arg4: memref<2x16x128xbf16, #tpu.memory_space<vmem>>, %arg5: memref<1x128xf32, #tpu.memory_space<vmem>>, %arg6: memref<1x8x128xbf16, #tpu.memory_space<vmem>>, %arg7: memref<16x16xbf16, #tpu.memory_space<vmem>>) attributes {dimension_semantics = [#tpu.dimension_semantics<parallel>, #tpu.dimension_semantics<parallel>], iteration_bounds = array<i64: 2, 1>, scalar_prefetch = 0 : i64, scratch_operands = 1 : i64, tpu.core_type = #tpu.core_type<tc>, window_params = [{transform_indices = @transform_0, window_bounds = array<i64: 1, 8, 16>}, {transform_indices = @transform_1, window_bounds = array<i64: 1, 8, 16>}, {pipeline_mode = #tpu.pipeline_mode<synchronous>, transform_indices = @transform_2, window_bounds = array<i64: 2, 16, 128>}, {pipeline_mode = #tpu.pipeline_mode<synchronous>, transform_indices = @transform_3, window_bounds = array<i64: 1, 128>}, {transform_indices = @transform_4, window_bounds = array<i64: 1, 8, 128>}]} {
    %c0 = arith.constant 0 : index
    %c0_0 = arith.constant 0 : index
    %c0_1 = arith.constant 0 : index
    %0 = vector.load %arg2[%c0, %c0_0, %c0_1] : memref<1x8x16xbf16, #tpu.memory_space<vmem>>, vector<1x8x16xbf16>
    %1 = vector.shape_cast %0 : vector<1x8x16xbf16> to vector<8x16xbf16>
    %c0_2 = arith.constant 0 : index
    %c0_3 = arith.constant 0 : index
    %c0_4 = arith.constant 0 : index
    %2 = vector.load %arg4[%c0_2, %c0_3, %c0_4] : memref<2x16x128xbf16, #tpu.memory_space<vmem>>, vector<1x16x128xbf16>
    %3 = vector.shape_cast %2 : vector<1x16x128xbf16> to vector<16x128xbf16>
    %cst = arith.constant dense<0.000000e+00> : vector<8x128xf32>
    %4 = tpu.matmul %1, %3, %cst {dimension_numbers = #tpu.dot_dimension_numbers<[1], [0], [0], [1], [0, 0, 1, 1], [], []>} : vector<8x16xbf16>, vector<16x128xbf16>, vector<8x128xf32> -> vector<8x128xf32>
    %c0_5 = arith.constant 0 : index
    %c0_6 = arith.constant 0 : index
    %c0_7 = arith.constant 0 : index
    %5 = vector.load %arg2[%c0_5, %c0_6, %c0_7] : memref<1x8x16xbf16, #tpu.memory_space<vmem>>, vector<1x8x16xbf16>
    %6 = vector.shape_cast %5 : vector<1x8x16xbf16> to vector<8x16xbf16>
    %c0_8 = arith.constant 0 : index
    %c0_9 = arith.constant 0 : index
    %7 = vector.load %arg7[%c0_8, %c0_9] : memref<16x16xbf16, #tpu.memory_space<vmem>>, vector<8x16xbf16>
    tpu.vector_store %arg7[%c0_8, %c0_9], %6 {strides = array<i32>} : memref<16x16xbf16, #tpu.memory_space<vmem>>, vector<8x16xbf16>,
    %c0_10 = arith.constant 0 : index
    %c0_11 = arith.constant 0 : index
    %c0_12 = arith.constant 0 : index
    %8 = vector.load %arg3[%c0_10, %c0_11, %c0_12] : memref<1x8x16xbf16, #tpu.memory_space<vmem>>, vector<1x8x16xbf16>
    %9 = vector.shape_cast %8 : vector<1x8x16xbf16> to vector<8x16xbf16>
    %c8 = arith.constant 8 : index
    %c0_13 = arith.constant 0 : index
    %10 = vector.load %arg7[%c8, %c0_13] : memref<16x16xbf16, #tpu.memory_space<vmem>>, vector<8x16xbf16>
    tpu.vector_store %arg7[%c8, %c0_13], %9 {strides = array<i32>} : memref<16x16xbf16, #tpu.memory_space<vmem>>, vector<8x16xbf16>,
    %c1 = arith.constant 1 : index
    %c0_14 = arith.constant 0 : index
    %11 = vector.load %arg7[%c1, %c0_14] : memref<16x16xbf16, #tpu.memory_space<vmem>>, vector<8x16xbf16>
    %c1_15 = arith.constant 1 : index
    %c0_16 = arith.constant 0 : index
    %c0_17 = arith.constant 0 : index
    %12 = vector.load %arg4[%c1_15, %c0_16, %c0_17] : memref<2x16x128xbf16, #tpu.memory_space<vmem>>, vector<1x16x128xbf16>
    %13 = vector.shape_cast %12 : vector<1x16x128xbf16> to vector<16x128xbf16>
    %cst_18 = arith.constant dense<0.000000e+00> : vector<8x128xf32>
    %14 = tpu.matmul %11, %13, %cst_18 {dimension_numbers = #tpu.dot_dimension_numbers<[1], [0], [0], [1], [0, 0, 1, 1], [], []>} : vector<8x16xbf16>, vector<16x128xbf16>, vector<8x128xf32> -> vector<8x128xf32>
    %15 = arith.addf %4, %14 : vector<8x128xf32>
    %c0_19 = arith.constant 0 : index
    %c0_20 = arith.constant 0 : index
    %16 = vector.load %arg5[%c0_19, %c0_20] : memref<1x128xf32, #tpu.memory_space<vmem>>, vector<1x128xf32>
    %17 = vector.broadcast %16 : vector<1x128xf32> to vector<8x128xf32>
    %18 = arith.addf %15, %17 : vector<8x128xf32>
    %cst_21 = arith.constant 0.000000e+00 : f32
    %19 = vector.broadcast %cst_21 : f32 to vector<8x128xf32>
    %20 = arith.maximumf %18, %19 : vector<8x128xf32>
    %21 = arith.truncf %20 : vector<8x128xf32> to vector<8x128xbf16>
    %c0_22 = arith.constant 0 : index
    %c0_23 = arith.constant 0 : index
    %c0_24 = arith.constant 0 : index
    %22 = vector.load %arg6[%c0_22, %c0_23, %c0_24] : memref<1x8x128xbf16, #tpu.memory_space<vmem>>, vector<1x8x128xbf16>
    %23 = vector.shape_cast %22 : vector<1x8x128xbf16> to vector<8x128xbf16>
    %24 = vector.shape_cast %21 : vector<8x128xbf16> to vector<1x8x128xbf16>
    tpu.vector_store %arg6[%c0_22, %c0_23, %c0_24], %24 {strides = array<i32>} : memref<1x8x128xbf16, #tpu.memory_space<vmem>>, vector<1x8x128xbf16>,
    return
  }
  func.func @transform_0(%arg0: i32, %arg1: i32) -> (i32, i32, i32) {
    %c0_i32 = arith.constant 0 : i32
    %c0_i32_0 = arith.constant 0 : i32
    return %arg0, %arg1, %c0_i32 : i32, i32, i32
  }
  func.func @transform_1(%arg0: i32, %arg1: i32) -> (i32, i32, i32) {
    %c1_i32 = arith.constant 1 : i32
    %0 = arith.addi %arg1, %c1_i32 : i32
    %c1_i32_0 = arith.constant 1 : i32
    %1 = arith.muli %0, %c1_i32_0 : i32
    %c0_i32 = arith.constant 0 : i32
    %c0_i32_1 = arith.constant 0 : i32
    return %arg0, %1, %c0_i32 : i32, i32, i32
  }
  func.func @transform_2(%arg0: i32, %arg1: i32) -> (i32, i32, i32) {
    %c0_i32 = arith.constant 0 : i32
    %c0_i32_0 = arith.constant 0 : i32
    %c0_i32_1 = arith.constant 0 : i32
    %c0_i32_2 = arith.constant 0 : i32
    return %c0_i32, %c0_i32_0, %c0_i32_1 : i32, i32, i32
  }
  func.func @transform_3(%arg0: i32, %arg1: i32) -> (i32, i32) {
    %c0_i32 = arith.constant 0 : i32
    %c0_i32_0 = arith.constant 0 : i32
    %c0_i32_1 = arith.constant 0 : i32
    return %c0_i32, %c0_i32_0 : i32, i32
  }
  func.func @transform_4(%arg0: i32, %arg1: i32) -> (i32, i32, i32) {
    %c0_i32 = arith.constant 0 : i32
    %c0_i32_0 = arith.constant 0 : i32
    return %arg0, %arg1, %c0_i32 : i32, i32, i32
  }
}

</mosaic_0001>

<bundles_post_ra>
// kernel: tpu_custom_call.1
= control target key start
LH: loop header
LB: loop body
LE: loop exit
PB: predicated region body
PF: predicated region fallthrough
CT: control target
= control target key end

     0   :  { %s1082_s0 = inlined_call_operand.hbm [shape: bf16[2,16,16], index: 0, kind: input, shape index: {}]   ;;  %s1083_s1 = inlined_call_operand.hbm [shape: bf16[2,16,16], index: 1, kind: input, shape index: {}]   ;;  %s1084_s2 = inlined_call_operand.hbm [shape: bf16[2,16,128], index: 2, kind: input, shape index: {}]   ;;  %s1085_s3 = inlined_call_operand.vmem [shape: f32[1,128], index: 3, kind: input, shape index: {}]   ;;  %s1086_s4 = inlined_call_operand.hbm [shape: bf16[2,8,128], index: 4, kind: output, shape index: {}]  }
   0x1   :  { %1088 = sst [smem:[#allocation15_spill]] %s1082_s0 }
   0x2   :  { %1089 = sst [smem:[#allocation16_spill]] %s1084_s2 }
   0x3   :  { %9 = vsyncpa [#allocation4], 0 }
   0x4   :  { %11 = vsyncpa [#allocation4 + $0x1], 0 }
   0x5   :  { %12 = vsyncpa [#allocation7], 0 }
   0x6   :  { %14 = vsyncpa [#allocation7 + $0x1], 0 }
   0x7   :  { %15 = vsyncpa [#allocation5], 0 }
   0x8   :  { %17 = vsyncpa [#allocation5 + $0x1], 0  ;;  %s891_s15 = smov 0   ;;  %s893_s16 = smov 0  }
   0x9   :  { %s895_s17 = smov 0   ;;  %s897_s18 = smov 0  }
   0xa   :  { %s899_s19 = smov 0   ;;  %s901_s20 = smov 0  }
   0xb LB: > { %s922_s21 = sadd.s32 4294967295, %s856_s20   ;;  %s557_s22 = sadd.s32 4294967294, %s856_s20   ;;  %s856_s20 = sphi %s901_s20, %s23_s20   ;;  %s852_s19 = sphi %s899_s19, %s1108_s19   ;;  %s848_s18 = sphi %s897_s18, %s1107_s18   ;;  %s844_s17 = sphi %s895_s17, %s1106_s17   ;;  %s840_s16 = sphi %s893_s16, %s1105_s16   ;;  %s836_s15 = sphi %s891_s15, %s1104_s15  }
   0xc   : > { %p57_p0 = scmp.ne.s32.totalorder %s840_s16, %s836_s15  ;;  %p58_p1 = scmp.eq.s32.totalorder %s922_s21, 0 }
   0xd   : > { %p161_p3 = scmp.eq.s32.totalorder %s557_s22, 1  ;;  %p558_p5 = scmp.ge.s32.totalorder %s856_s20, 1 }
   0xe   : > { %p931_p4 = por %p58_p1, %p57_p0  ;;  %p168_p7 = scmp.lt.s32.totalorder %s856_s20, 3 }
   0xf   : > { %p936_p6 = por %p161_p3, %p57_p0  ;;  %s858_s26 = smov [#allocation8]  }
  0x10   : > { %p941_p8 = pnand %p558_p5, %p168_p7  ;;  %s180_s27 = sshll.u32 %s858_s26, 4  ;;  %s181_s27 = int_to_ptr.vmem [resolvable:$true] %s180_s27 }
  0x11   : > { %s1091_s24 = scalar_select %p936_p6, 1, 0 }
  0x12   : > { %p610_p9 = pneg %p941_p8  ;;  %s35_s29 = sadd.s32 1, %s852_s19 }
  0x13   : > { %s696_s30 = scalar_lea.vmem %s181_s27, 256  ;;  %p704_p5 = scmp.lt.s32.totalorder %s181_s27, %s181_s27 }
  0x14   : > { %p950_p11 = pnand %p610_p9, %p58_p1  ;;  %p697_p13 = scmp.ne.s32.totalorder %s181_s27, %s696_s30 }
  0x15   : > { %p705_p7 = scmp.lt.s32.totalorder %s696_s30, %s696_s30 }
  0x16   : > { %p687_p12 = pneg %p950_p11 }
  0x17   : > { %p706_p2 = por %p705_p7, %p704_p5 }
  0x18   : > { %p699_p0 = pnand %p697_p13, %p687_p12 }
  0x1a   : > { %p700_p3 = pneg %p699_p0 }
  0x1c   : > { %p707_p6 = pnand %p706_p2, %p700_p3 }
  0x1e   : > { %710 = shalt.err (!%p707_p6)
}
  0x1f   : > { %s859_s5 = smov 64   ;;  %s860_s6 = smov 4  }
  0x20   : > { %s1094_s2 = sld [smem:[#allocation16_spill]]  ;;  %p37_p2 = scmp.ge.s32.totalorder %s35_s29, 2 }
  0x21   : > { %s44_s9 = sadd.s32 1, %s844_s17  ;;  %p51_p6 = scmp.ne.s32.totalorder %s844_s17, %s840_s16 }
  0x22   : > { %p52_p9 = scmp.eq.s32.totalorder %s856_s20, 0  ;;  %s1110_s29 = smov (%p37_p2, %s35_s29), 0 }
  0x23   : > { %1095 = sst [smem:[#allocation14_spill]] %s1110_s29  ;;  %p1097_p13 = scmp.eq.s32.totalorder %s922_s21, 1 }
  0x24   : > { %p968_p12 = por %p52_p9, %p51_p6  ;;  %s39_s12 = ssub.s32 %s852_s19, %s1110_s29 }
  0x25   : > { %p974_p0 = por %p1097_p13, %p51_p6  ;;  %p42_p3 = scmp.eq.s32.totalorder %s39_s12, 0 }
  0x26   : > { %613 = dma.hbm_to_vmem [thread:$0]  (!%p950_p11), %s1094_s2, 256, %s181_s27, [#allocation7], %s859_s5, %s859_s5, %s860_s6  }
  0x27   : > { %p626_p11 = scmp.lt.s32.totalorder %s856_s20, 2  ;;  %s197_s13 = sand.u32 1, %s844_s17  }
  0x28   : > { %s561_s14 = sshll.u32 %s197_s13, 2  ;;  %s582_s26 = sshll.u32 %s852_s19, 7 }
  0x29   : > { %s983_s22 = scalar_select %p42_p3, %s844_s17, %s44_s9  }
  0x2a   : > { %s1099_s0 = sld [smem:[#allocation15_spill]]  ;;  %s201_s5 = scalar_lea.vmem [#allocation3], %s561_s14 }
  0x2b   : > { %s210_s6 = sshll.u32 %s201_s5, 4  ;;  %p991_p5 = pnand %p626_p11, %p968_p12  ;;  %s211_s6 = int_to_ptr.vmem [resolvable:$true] %s210_s6 }
  0x2c   : > { %s998_s9 = scalar_lea.hbm %s1083_s1, %s582_s26  ;;  %s217_s12 = sand.u32 1, %s856_s20  }
  0x2d   : > { %s198_s29 = scalar_lea.sflag [#allocation4], %s197_s13  ;;  %p713_p7 = pneg %p991_p5 }
  0x2e   : > { %s724_s27 = scalar_lea.vmem %s211_s6, 64  ;;  %s861_s10 = smov [#allocation3]  }
  0x2f   : > { %p725_p2 = scmp.ne.s32.totalorder %s211_s6, %s724_s27  ;;  %s729_s28 = sshll.u32 %s861_s10, 4  ;;  %s730_s28 = int_to_ptr.vmem [resolvable:$false] %s729_s28 }
  0x30   : > { %s208_s30 = scalar_lea.hbm %s1099_s0, %s582_s26  ;;  %s731_s5 = scalar_lea.vmem %s730_s28, 128 }
  0x31   : > { %p727_p6 = pnand %p725_p2, %p713_p7  ;;  %p732_p12 = scmp.lt.s32.totalorder %s211_s6, %s730_s28 }
  0x32   : > { %p733_p13 = scmp.lt.s32.totalorder %s731_s5, %s724_s27 }
  0x33   : > { %p728_p9 = pneg %p727_p6 }
  0x34   : > { %p734_p11 = por %p733_p13, %p732_p12 }
  0x36   : > { %p735_p3 = pnand %p734_p11, %p728_p9 }
  0x38   : > { %738 = shalt.err (!%p735_p3)
}
  0x39   : > { %617 = dma.hbm_to_vmem [thread:$0]  (!%p991_p5), %s208_s30, 64, %s211_s6, %s198_s29  }
  0x3a   : > { %s481_s2 = scalar_lea.hbm %s998_s9, 64  ;;  %s221_s13 = scalar_lea.vmem [#allocation6], %s561_s14 }
  0x3b   : > { %s231_s26 = sshll.u32 %s221_s13, 4  ;;  %s218_s8 = scalar_lea.sflag [#allocation7], %s217_s12  ;;  %s232_s26 = int_to_ptr.vmem [resolvable:$true] %s231_s26 }
  0x3c   : > { %s752_s0 = scalar_lea.vmem %s232_s26, 64  ;;  %s862_s27 = smov [#allocation6]  }
  0x3d   : > { %p753_p2 = scmp.ne.s32.totalorder %s232_s26, %s752_s0  ;;  %s757_s10 = sshll.u32 %s862_s27, 4  ;;  %s758_s10 = int_to_ptr.vmem [resolvable:$false] %s757_s10 }
  0x3e   : > { %s759_s28 = scalar_lea.vmem %s758_s10, 128  ;;  %p760_p9 = scmp.lt.s32.totalorder %s232_s26, %s758_s10 }
  0x3f   : > { %p755_p6 = pnand %p753_p2, %p713_p7  ;;  %p761_p12 = scmp.lt.s32.totalorder %s759_s28, %s752_s0 }
  0x41   : > { %p756_p10 = pneg %p755_p6  ;;  %p762_p13 = por %p761_p12, %p760_p9 }
  0x43   : > { %p763_p11 = pnand %p762_p13, %p756_p10 }
  0x45   : > { %766 = shalt.err (!%p763_p11)
}
  0x46   : > { %620 = dma.hbm_to_vmem [thread:$0]  (!%p991_p5), %s481_s2, 64, %s232_s26, %s218_s8  }
  0x47   : > { %240 = sbr.rel (%p941_p8) target bundleno = 312 (0x138), region = 36  ;;  %s1017_s29 = sand.u32 (!%p941_p8), 1, %s840_s16  }
  0x48   : > { %s1020_s14 = sshll.u32 (!%p941_p8), %s1017_s29, 2  ;;  %s243_s30 = scalar_lea.sflag (!%p941_p8), [#allocation4], %s1017_s29 }
  0x49   : > { %s246_s0 = scalar_lea.vmem (!%p941_p8), [#allocation3], %s1020_s14 }
  0x4c   : > { %819 = dma.done.wait (%p931_p4), %s243_s30, 64  }
  0x4d   : > { %821 = vsyncadd (%p931_p4), %s243_s30, 4294967232  ;;  %s251_s25 = sand.u32 1, %s922_s21   ;;  %s255_s7 = scalar_lea.vmem [#allocation6], %s1020_s14 }
  0x4e   : > { %s252_s6 = scalar_lea.sflag [#allocation7], %s251_s25 }
  0x4f   : > { %823 = dma.done.wait (%p931_p4), %s252_s6, 64  }
  0x50   : > { %825 = vsyncadd (%p931_p4), %s252_s6, 4294967232 }
  0x51   : > { %827 = dma.done.wait (%p58_p1), [#allocation7], 256  }
  0x52   : > { %829 = vsyncadd (%p58_p1), [#allocation7], 4294967040  ;;  %v863_v0 = vmov 0.0   ;;  %vm864_vm0 = vmmov 0   ;;  %vm294_vm1 = vcmask 125952   ;;  %v682_v1 = vld [vmem:[#allocation8] sm:$0xff]  }
  0x53   : > { %594 = vmatprep.subr.bf16.mxu1 %v863_v0  ;;  %596 = vmatprep.mubr.msk.bf16.mxu1 %vm864_vm0, %v863_v0  ;;  %v291_v2 = vld [vmem:[%s246_s0] sm:$0xf]  ;;  %v296_v3 = vld [vmem:[%s255_s7] sm:$0xf]  ;;  %vm321_vm2 = vcmask 130048   ;;  %v683_v4 = vld [vmem:[#allocation8 + $0x8] sm:$0xff]  }
  0x54   : > { %588 = vmatprep.subr.bf16.mxu0 %v863_v0  ;;  %590 = vmatprep.mubr.msk.bf16.mxu0 %vm864_vm0, %v863_v0  ;;  %295 = vst.msk [vmem:[#allocation2] sm:$0xf] %vm294_vm1, %v291_v2  ;;  %297 = vst.msk [vmem:[#allocation2 + $0x4] sm:$0xf] %vm294_vm1, %v296_v3  ;;  %v577_v15 = vld [vmem:[%s1085_s3] ss:$0 sm:$0xff] }
  0x55   : > { %595 = vmatpush3.bf16.msra.mxu1 %v682_v1  ;;  %589 = vmatpush3.bf16.msra.mxu0 %v683_v4  ;;  %s579_s9 = sshll.u32 %s848_s18, 6  ;;  %s288_s12 = scalar_lea.vmem [#allocation9], %s1020_s14 }
  0x56   : > { %s440_s5 = sshll.u32 %s288_s12, 4  ;;  %s438_s26 = scalar_lea.hbm %s1086_s4, %s579_s9  ;;  %s441_s5 = int_to_ptr.vmem [resolvable:$true] %s440_s5 }
  0x57   : > { %s426_s8 = scalar_lea.sflag [#allocation5], %s1017_s29  ;;  %s768_s27 = scalar_lea.vmem %s441_s5, 64 }
  0x58   : > { %597 = vmatmul.mubr.msk.bf16.vlgmr.msra.gmra.mxu1 %vm321_vm2, %v291_v2  ;;  %p769_p1 = scmp.ne.s32.totalorder %s441_s5, %s768_s27  ;;  %s865_s10 = smov [#allocation9]  }
  0x59   : > { %s772_s28 = sshll.u32 %s865_s10, 4  ;;  %s773_s28 = int_to_ptr.vmem [resolvable:$false] %s772_s28 }
  0x5a   : > { %p770_p4 = pnand %p769_p1, %p974_p0  ;;  %s774_s18 = scalar_lea.vmem %s773_s28, 128 }
  0x5b   : > { %v684_v5 = vld [vmem:[#allocation2] sm:$0x1f]   ;;  %p775_p10 = scmp.lt.s32.totalorder %s441_s5, %s773_s28  ;;  %p776_p5 = scmp.lt.s32.totalorder %s774_s18, %s768_s27 }
  0x5c   : > { %v309_v6 = vshrl.u32 %v684_v5, 16  ;;  %v311_v7 = vshll.u32 %v684_v5, 16  ;;  %p771_p8 = pneg %p770_p4 }
  0x5d   : > { %p777_p7 = por %p776_p5, %p775_p10 }
  0x5e   : > { %v313_v8 = vrot.slane %v311_v7, 1 }
  0x5f   : > { %p778_p3 = pnand %p777_p7, %p771_p8 }
  0x60   : > { %v314_v9 = vor.u32 %v313_v8, %v309_v6 }
  0x62   : > { %591 = vmatmul.mubr.msk.bf16.vlgmr.msra.gmra.mxu0 %vm321_vm2, %v314_v9 }
 0x118   : > { %v408_v10 = vpop.f32.mrf.mxu1 }
 0x11a   : > { %v598_v11 = vpop.f32.mrf.mxu1 }
 0x11c   : > { %v411_v12 = vpop.f32.mrf.mxu1 }
 0x11e   : > { %v599_v13 = vpop.f32.mrf.mxu1 }
 0x122   : > { %v359_v14 = vpop.f32.mrf.mxu0 }
 0x123   : > { %v409_v16 = vadd.f32 %v408_v10, %v359_v14 }
 0x124   : > { %v592_v17 = vpop.f32.mrf.mxu0 }
 0x125   : > { %v421_v18 = vadd.f32 %v577_v15, %v409_v16 }
 0x126   : > { %v362_v19 = vpop.f32.mrf.mxu0 }
 0x127   : > { %v422_v20 = vmax.f32 %v421_v18, 0.0 }
 0x128   : > { %v593_v21 = vpop.f32.mrf.mxu0 }
 0x129   : > { %v423_v22 = vpack.c.bf16 %v422_v20, %v422_v20 }
 0x12b   : > { %424 = vst [vmem:[%s288_s12] sm:$0xf] %v423_v22 }
 0x12c   : > { %781 = shalt.err (!%p778_p3)
}
 0x12d   : > { %s782_s14 = scalar_lea.hbm %s438_s26, 64  ;;  %s786_s0 = scalar_lea.hbm %s1086_s4, 128 }
 0x12e   : > { %p783_p2 = scmp.ne.s32.totalorder %s438_s26, %s782_s14  ;;  %p787_p12 = scmp.lt.s32.totalorder %s438_s26, %s1086_s4 }
 0x12f   : > { %p788_p13 = scmp.lt.s32.totalorder %s786_s0, %s782_s14 }
 0x130   : > { %p784_p6 = pnand %p783_p2, %p974_p0 }
 0x131   : > { %p789_p11 = por %p788_p13, %p787_p12 }
 0x132   : > { %p785_p9 = pneg %p784_p6 }
 0x134   : > { %p790_p1 = pnand %p789_p11, %p785_p9 }
 0x136   : > { %793 = shalt.err (!%p790_p1)
}
 0x137   : > { %608 = dma.vmem_to_hbm [thread:$0]  (%p974_p0), %s441_s5, 64, %s438_s26, %s426_s8  }
 0x138 PF: > { %s452_s7 = sand.u32 1, %s836_s15   ;;  %p1101_p4 = scmp.ne.s32.totalorder %s1091_s24, 0 }
 0x139   : > { %p1102_p8 = scmp.ge.s32.totalorder %s856_s20, 2  ;;  %s453_s21 = scalar_lea.sflag [#allocation5], %s452_s7 }
 0x13b   : > { %p622_p10 = pnand %p1102_p8, %p1101_p4 }
 0x13d   : > { %p623_p5 = pneg %p622_p10 }
 0x13f   : > { %831 = dma.done.wait (%p623_p5), %s453_s21, 64  }
 0x140   : > { %833 = vsyncadd (%p623_p5), %s453_s21, 4294967232  ;;  %s23_s20 = sadd.s32 1, %s856_s20   ;;  %s1103_s11 = sld [smem:[#allocation14_spill]] }
 0x141   : > { %p20_p7 = scmp.ge.s32.totalorder %s23_s20, 4   ;;  %s1104_s15 = smov %s840_s16 }
 0x142   : > { %s1105_s16 = smov %s844_s17  ;;  %s1106_s17 = smov %s983_s22 }
 0x143   : > { %s1107_s18 = smov %s852_s19  ;;  %22 = sbr.rel (!%p20_p7) target bundleno = 11 (0xb), region = 99 }
 0x146   : > { %s1108_s19 = smov %s1103_s11 }
 0x148   :  { %458 = vsyncpa [#allocation4], 1 }
 0x149   :  { %460 = vsyncpa [#allocation4 + $0x1], 1 }
 0x14a   :  { %461 = vsyncpa [#allocation7], 1 }
 0x14b   :  { %463 = vsyncpa [#allocation7 + $0x1], 1 }
 0x14c   :  { %464 = vsyncpa [#allocation5], 1 }
 0x14d   :  { %466 = vsyncpa [#allocation5 + $0x1], 1 }

</bundles_post_ra>
